<compile_context>
chip_gen: v5e
topology: v5e:2x2
jax: 0.10.0
libtpu: 0.0.40
codegen_flags: <defaults>
</compile_context>

<pallas_src>
import jax
import jax.numpy as jnp
from jax.experimental import pallas as pl
from jax.experimental.pallas import tpu as pltpu


def _landmark_head_kernel(x_ref, w_ref, b_ref, o_ref):
    # x_ref: (1, Cin, Thw)   native-NCHW slab, spatial positions on lanes
    # w_ref: (Cpad, Cin)     zero-padded 1x1 conv weight (resident block)
    # b_ref: (1, Cpad)       zero-padded bias             (resident block)
    # o_ref: (1, Thw, Cout)  NHWC-style output rows
    cout = o_ref.shape[-1]
    # MXU: channel contraction in the input's native orientation -> (Cpad, Thw)
    acc = jnp.dot(w_ref[...], x_ref[0], preferred_element_type=jnp.float32)
    # XLU: transpose the *small* result tile (never the big input); VPU: +bias.
    rows = acc.T + b_ref[...]                       # (Thw, Cpad) in f32
    o_ref[0] = rows[:, :cout].astype(o_ref.dtype)   # drop pad lanes, store


def _pick_tile_hw(hw, cin, in_bytes, budget_bytes=20 << 20, max_tile=8192):
    """Largest lane-aligned spatial tile whose double-buffered input block plus
    lane-padded f32 output block fits in `budget_bytes` of VMEM."""
    per_pos = 2 * cin * in_bytes + 2 * 128 * 4  # 2x in-buf + 2x out-buf (128-lane pad)
    t = budget_bytes // max(per_pos, 1)
    t = min(t, max_tile)
    if t >= hw:
        return hw                                # single full-extent block
    return max(128, (t // 128) * 128)


def landmark_head_forward(x_nchw, weight, bias, num_anchors=3):
    """LandmarkHead.forward:
        conv1x1(x).permute(0, 2, 3, 1).contiguous().view(N, -1, 10)
    x_nchw: (N, Cin, H, W); weight: (Cout, Cin[,1,1]); bias: (Cout,).
    Returns (N, H*W*num_anchors, 10)."""
    N, Cin, H, W = x_nchw.shape
    Cout = weight.shape[0]
    assert Cout == num_anchors * 10
    HW = H * W

    # Keep NCHW; merging H,W is contiguous -> free (no HBM round trip).
    x3 = x_nchw.reshape(N, Cin, HW)

    # Pad Cout up to a multiple of 8 so the in-kernel transpose is tile-aligned.
    Cpad = ((Cout + 7) // 8) * 8
    w_p = jnp.pad(weight.reshape(Cout, Cin),
                  ((0, Cpad - Cout), (0, 0))).astype(x_nchw.dtype)   # (Cpad, Cin)
    b_p = jnp.pad(bias.reshape(-1),
                  (0, Cpad - Cout)).reshape(1, Cpad).astype(jnp.float32)

    in_bytes = jnp.dtype(x_nchw.dtype).itemsize
    thw = _pick_tile_hw(HW, Cin, in_bytes)
    grid = (N, pl.cdiv(HW, thw))

    cost = pl.CostEstimate(
        flops=2 * N * HW * Cin * Cout,
        transcendentals=0,
        bytes_accessed=(x3.size * in_bytes + N * HW * Cout * in_bytes
                        + w_p.size * in_bytes + b_p.size * 4),
    )

    out = pl.pallas_call(
        _landmark_head_kernel,
        out_shape=jax.ShapeDtypeStruct((N, HW, Cout), x_nchw.dtype),
        grid_spec=pltpu.PrefetchScalarGridSpec(
            num_scalar_prefetch=0,
            grid=grid,
            in_specs=[
                pl.BlockSpec((1, Cin, thw), lambda n, t: (n, 0, t)),
                pl.BlockSpec((Cpad, Cin), lambda n, t: (0, 0)),
                pl.BlockSpec((1, Cpad), lambda n, t: (0, 0)),
            ],
            out_specs=pl.BlockSpec((1, thw, Cout), lambda n, t: (n, t, 0)),
        ),
        compiler_params=pltpu.CompilerParams(
            dimension_semantics=("parallel", "parallel"),
            vmem_limit_bytes=28 << 20),
        cost_estimate=cost,
    )(x3, w_p, b_p)

    # (N, HW, A*10) -> (N, HW*A, 10): contiguous split, free.
    return out.reshape(N, HW * num_anchors, 10)


if __name__ == "__main__":
    # Small shapes consistent with the module (num_anchors=3).
    N, Cin, H, W = 2, 32, 16, 16
    num_anchors = 3
    Cout = num_anchors * 10

    key = jax.random.PRNGKey(0)
    kx, kw, kb = jax.random.split(key, 3)
    x = jax.random.normal(kx, (N, Cin, H, W), dtype=jnp.float32)
    # Deterministic synthetic Conv2d(Cin, Cout, 1) parameters.
    weight = jax.random.normal(kw, (Cout, Cin), dtype=jnp.float32) * 0.05
    bias = jax.random.normal(kb, (Cout,), dtype=jnp.float32) * 0.05

    out = landmark_head_forward(x, weight, bias, num_anchors=num_anchors)
    out = jax.block_until_ready(out)

    # Pure-JAX reference of the same semantics.
    ref = (jnp.einsum("nchw,oc->nhwo", x, weight) + bias).reshape(
        N, H * W * num_anchors, 10)
    assert out.shape == (N, H * W * num_anchors, 10)
    assert jnp.allclose(out, ref, atol=1e-4, rtol=1e-4)

    print("KERNEL_OK")
</pallas_src>

<mosaic_0001>
module attributes {stable_mosaic.version = 11 : i64} {
  func.func @_landmark_head_kernel(%arg0: i32, %arg1: i32, %arg2: memref<1x32x256xf32, #tpu.memory_space<vmem>>, %arg3: memref<32x32xf32, #tpu.memory_space<vmem>>, %arg4: memref<1x32xf32, #tpu.memory_space<vmem>>, %arg5: memref<1x256x30xf32, #tpu.memory_space<vmem>>) attributes {dimension_semantics = [#tpu.dimension_semantics<parallel>, #tpu.dimension_semantics<parallel>], iteration_bounds = array<i64: 2, 1>, scalar_prefetch = 0 : i64, scratch_operands = 0 : i64, tpu.core_type = #tpu.core_type<tc>, window_params = [{transform_indices = @transform_0, window_bounds = array<i64: 1, 32, 256>}, {pipeline_mode = #tpu.pipeline_mode<synchronous>, transform_indices = @transform_1, window_bounds = array<i64: 32, 32>}, {pipeline_mode = #tpu.pipeline_mode<synchronous>, transform_indices = @transform_2, window_bounds = array<i64: 1, 32>}, {transform_indices = @transform_3, window_bounds = array<i64: 1, 256, 30>}]} {
    %c0 = arith.constant 0 : index
    %c0_0 = arith.constant 0 : index
    %0 = vector.load %arg3[%c0, %c0_0] : memref<32x32xf32, #tpu.memory_space<vmem>>, vector<32x32xf32>
    %c0_1 = arith.constant 0 : index
    %c0_2 = arith.constant 0 : index
    %c0_3 = arith.constant 0 : index
    %1 = vector.load %arg2[%c0_1, %c0_2, %c0_3] : memref<1x32x256xf32, #tpu.memory_space<vmem>>, vector<1x32x256xf32>
    %2 = vector.shape_cast %1 : vector<1x32x256xf32> to vector<32x256xf32>
    %cst = arith.constant dense<0.000000e+00> : vector<32x256xf32>
    %3 = tpu.matmul %0, %2, %cst {dimension_numbers = #tpu.dot_dimension_numbers<[1], [0], [0], [1], [0, 0, 1, 1], [], []>} : vector<32x32xf32>, vector<32x256xf32>, vector<32x256xf32> -> vector<32x256xf32>
    %4 = tpu.transpose %3, [1, 0] : vector<32x256xf32> -> vector<256x32xf32>
    %c0_4 = arith.constant 0 : index
    %c0_5 = arith.constant 0 : index
    %5 = vector.load %arg4[%c0_4, %c0_5] : memref<1x32xf32, #tpu.memory_space<vmem>>, vector<1x32xf32>
    %6 = vector.broadcast %5 : vector<1x32xf32> to vector<256x32xf32>
    %7 = arith.addf %4, %6 : vector<256x32xf32>
    %8 = vector.extract_strided_slice %7 {offsets = [0, 0], sizes = [256, 30], strides = [1, 1]} : vector<256x32xf32> to vector<256x30xf32>
    %c0_6 = arith.constant 0 : index
    %c0_7 = arith.constant 0 : index
    %c0_8 = arith.constant 0 : index
    %9 = vector.load %arg5[%c0_6, %c0_7, %c0_8] : memref<1x256x30xf32, #tpu.memory_space<vmem>>, vector<1x256x30xf32>
    %10 = vector.shape_cast %9 : vector<1x256x30xf32> to vector<256x30xf32>
    %11 = vector.shape_cast %8 : vector<256x30xf32> to vector<1x256x30xf32>
    tpu.vector_store %arg5[%c0_6, %c0_7, %c0_8], %11 {strides = array<i32>} : memref<1x256x30xf32, #tpu.memory_space<vmem>>, vector<1x256x30xf32>,
    return
  }
  func.func @transform_0(%arg0: i32, %arg1: i32) -> (i32, i32, i32) {
    %c0_i32 = arith.constant 0 : i32
    %c0_i32_0 = arith.constant 0 : i32
    return %arg0, %c0_i32, %arg1 : i32, i32, i32
  }
  func.func @transform_1(%arg0: i32, %arg1: i32) -> (i32, i32) {
    %c0_i32 = arith.constant 0 : i32
    %c0_i32_0 = arith.constant 0 : i32
    %c0_i32_1 = arith.constant 0 : i32
    return %c0_i32, %c0_i32_0 : i32, i32
  }
  func.func @transform_2(%arg0: i32, %arg1: i32) -> (i32, i32) {
    %c0_i32 = arith.constant 0 : i32
    %c0_i32_0 = arith.constant 0 : i32
    %c0_i32_1 = arith.constant 0 : i32
    return %c0_i32, %c0_i32_0 : i32, i32
  }
  func.func @transform_3(%arg0: i32, %arg1: i32) -> (i32, i32, i32) {
    %c0_i32 = arith.constant 0 : i32
    %c0_i32_0 = arith.constant 0 : i32
    return %arg0, %arg1, %c0_i32 : i32, i32, i32
  }
}

</mosaic_0001>

<bundles_post_ra>
// kernel: tpu_custom_call.1
= control target key start
LH: loop header
LB: loop body
LE: loop exit
PB: predicated region body
PF: predicated region fallthrough
CT: control target
= control target key end

     0   :  { %8 = vsyncpa [#allocation3], 0  ;;  %s1029_s0 = inlined_call_operand.hbm [shape: f32[2,32,256], index: 0, kind: input, shape index: {}]   ;;  %s1030_s1 = inlined_call_operand.hbm [shape: f32[32,32], index: 1, kind: input, shape index: {}]   ;;  %s1031_s2 = inlined_call_operand.vmem [shape: f32[1,32], index: 2, kind: input, shape index: {}]   ;;  %s1032_s3 = inlined_call_operand.vmem [shape: f32[2,256,30], index: 3, kind: output, shape index: {}]  }
   0x1   :  { %10 = vsyncpa [#allocation3 + $0x1], 0 }
   0x2   :  { %11 = vsyncpa [#allocation5], 0  ;;  %s805_s12 = smov 0   ;;  %s807_s13 = smov 0  }
   0x3   :  { %s809_s14 = smov 0   ;;  %s811_s15 = smov 0  }
   0x4   :  { %s813_s16 = smov 0   ;;  %s815_s17 = smov 0  }
   0x5 LB: > { %s559_s18 = sadd.s32 4294967295, %s778_s17   ;;  %p51_p0 = scmp.ne.s32.totalorder %s762_s13, %s758_s12  ;;  %s778_s17 = sphi %s815_s17, %s17_s17   ;;  %s774_s16 = sphi %s813_s16, %s1041_s16   ;;  %s770_s15 = sphi %s811_s15, %s1040_s15   ;;  %s766_s14 = sphi %s809_s14, %s1039_s14   ;;  %s762_s13 = sphi %s807_s13, %s1038_s13   ;;  %s758_s12 = sphi %s805_s12, %s1037_s12  }
   0x6   : > { %p835_p1 = scmp.eq.s32.totalorder %s559_s18, 0  ;;  %p561_p2 = scmp.ge.s32.totalorder %s778_s17, 1 }
   0x7   : > { %p132_p3 = scmp.lt.s32.totalorder %s778_s17, 3  ;;  %s143_s23 = sshll.u32 %s1030_s1, 4  ;;  %s144_s23 = int_to_ptr.hbm [resolvable:$true] %s143_s23 }
   0x8   : > { %p843_p4 = por %p835_p1, %p51_p0  ;;  %s780_s25 = smov [#allocation4]  }
   0x9   : > { %p850_p5 = pnand %p561_p2, %p132_p3  ;;  %s145_s26 = sshll.u32 %s780_s25, 4  ;;  %s146_s26 = int_to_ptr.vmem [resolvable:$true] %s145_s26 }
   0xa   : > { %s781_s27 = smov 128   ;;  %s782_s28 = smov 8  }
   0xb   : > { %p598_p6 = pneg %p850_p5  ;;  %s29_s29 = sadd.s32 1, %s774_s16 }
   0xc   : > { %p31_p8 = scmp.ge.s32.totalorder %s29_s29, 2  ;;  %s38_s30 = sadd.s32 1, %s766_s14 }
   0xd   : > { %p599_p7 = pnand %p598_p6, %p835_p1  ;;  %p45_p9 = scmp.ne.s32.totalorder %s766_s14, %s762_s13 }
   0xe   : > { %p46_p10 = scmp.eq.s32.totalorder %s778_s17, 0  ;;  %s1043_s29 = smov (%p31_p8, %s29_s29), 0 }
   0xf   : > { %601 = dma.hbm_to_vmem [thread:$0]  (!%p599_p7), %s144_s23, 512, %s146_s26, [#allocation5], %s781_s27, %s781_s27, %s782_s28  }
  0x10   : > { %p865_p11 = por %p46_p10, %p45_p9  ;;  %p607_p12 = scmp.lt.s32.totalorder %s778_s17, 2 }
  0x11   : > { %s33_s5 = ssub.s32 %s774_s16, %s1043_s29  ;;  %s162_s6 = sand.u32 1, %s766_s14  }
  0x12   : > { %p36_p13 = scmp.eq.s32.totalorder %s33_s5, 0  ;;  %s564_s7 = sshll.u32 %s162_s6, 6 }
  0x13   : > { %s582_s8 = sshll.u32 %s774_s16, 6  ;;  %s166_s21 = scalar_lea.vmem [#allocation2], %s564_s7 }
  0x14   : > { %s875_s9 = scalar_select %p36_p13, %s766_s14, %s38_s30  }
  0x15   : > { %s173_s12 = scalar_lea.hbm %s1029_s0, %s582_s8  ;;  %s176_s22 = sshll.u32 %s166_s21, 4  ;;  %s177_s22 = int_to_ptr.vmem [resolvable:$true] %s176_s22 }
  0x16   : > { %s174_s18 = sshll.u32 %s173_s12, 4  ;;  %p603_p0 = pnand %p607_p12, %p865_p11  ;;  %s175_s18 = int_to_ptr.hbm [resolvable:$true] %s174_s18 }
  0x17   : > { %s163_s23 = scalar_lea.sflag [#allocation3], %s162_s6  ;;  %s783_s25 = smov 256  }
  0x18   : > { %s784_s26 = smov 16   ;;  %188 = sbr.rel (%p850_p5) target bundleno = 455 (0x1c7), region = 32 }
  0x19   : > { %605 = dma.hbm_to_vmem [thread:$0]  (!%p603_p0), %s175_s18, 1024, %s177_s22, %s163_s23, %s783_s25, %s783_s25, %s784_s26  }
  0x1a   : > { %s190_s27 = sand.u32 (!%p850_p5), 1, %s762_s13  }
  0x1b   : > { %s568_s28 = sshll.u32 (!%p850_p5), %s190_s27, 6  ;;  %s191_s30 = scalar_lea.sflag (!%p850_p5), [#allocation3], %s190_s27 }
  0x1c   : > { %s194_s5 = scalar_lea.vmem (!%p850_p5), [#allocation2], %s568_s28 }
  0x1d   : > { %749 = dma.done.wait (%p843_p4), %s191_s30, 1024  }
  0x1e   : > { %751 = vsyncadd (%p843_p4), %s191_s30, 4294966272 }
  0x1f   : > { %753 = dma.done.wait (%p835_p1), [#allocation5], 512  }
  0x20   : > { %755 = vsyncadd (%p835_p1), [#allocation5], 4294966784  ;;  %v248_v0 = vld [vmem:[%s194_s5 + $0x30] sm:$0xff]  ;;  %v249_v1 = vld [vmem:[%s194_s5 + $0x38] sm:$0xff]  ;;  %vm250_vm0 = vcmask 261120   ;;  %p229_p1 = scmp.lt.s32.totalorder %s770_s15, 1 }
  0x21   : > { %v246_v2 = vld [vmem:[%s194_s5 + $0x20] sm:$0xff]  ;;  %275 = vmatpush.msra.mxu0 %v248_v0  ;;  %304 = vmatpush.msra.mxu1 %v249_v1  ;;  %v247_v3 = vld [vmem:[%s194_s5 + $0x28] sm:$0xff]  ;;  %v244_v4 = vld [vmem:[%s194_s5 + $0x10] sm:$0xff]  ;;  %vm421_vm1 = vcmask 244736  }
  0x22   : > { %v245_v5 = vld [vmem:[%s194_s5 + $0x18] sm:$0xff]  ;;  %584 = vmatpush.msra.mxu2 %v248_v0  ;;  %588 = vmatpush.msra.mxu3 %v249_v1  ;;  %v242_v6 = vld [vmem:[%s194_s5] sm:$0xff]  ;;  %v243_v7 = vld [vmem:[%s194_s5 + $0x8] sm:$0xff]  ;;  %s1045_s15 = smov (!%p229_p1, %s770_s15), 1 }
  0x23   : > { %276 = vmatpush.msra.mxu0 %v246_v2  ;;  %305 = vmatpush.msra.mxu1 %v247_v3  ;;  %v238_v8 = vld [vmem:[#allocation4] sm:$0xff]  ;;  %v240_v9 = vld [vmem:[#allocation4 + $0x10] sm:$0xff]  ;;  %v239_v10 = vld [vmem:[#allocation4 + $0x8] sm:$0xff]  ;;  %s583_s19 = sshll.u32 %s1045_s15, 8 }
  0x24   : > { %585 = vmatpush.msra.mxu2 %v246_v2  ;;  %589 = vmatpush.msra.mxu3 %v247_v3  ;;  %v241_v11 = vld [vmem:[#allocation4 + $0x18] sm:$0xff]  ;;  %v908_v20 = vld [vmem:[%s1031_s2] ss:$0 sm:$0xff]  ;;  %s913_s7 = scalar_lea.vmem %s1032_s3, %s583_s19 }
  0x25   : > { %277 = vmatpush.msra.mxu0 %v244_v4  ;;  %306 = vmatpush.msra.mxu1 %v245_v5 }
  0x26   : > { %586 = vmatpush.msra.mxu2 %v244_v4  ;;  %590 = vmatpush.msra.mxu3 %v245_v5 }
  0x27   : > { %278 = vmatpush.msra.mxu0 %v242_v6  ;;  %307 = vmatpush.msra.mxu1 %v243_v7 }
  0x28   : > { %572 = vmatmul.msk.f32.vlgmr.msra.gmra.mxu0 %vm250_vm0, %v238_v8  ;;  %576 = vmatmul.msk.f32.vlgmr.msra.gmra.mxu1 %vm250_vm0, %v238_v8 }
  0x29   : > { %587 = vmatpush.msra.mxu2 %v242_v6  ;;  %591 = vmatpush.msra.mxu3 %v243_v7 }
  0x2a   : > { %574 = vmatmul.msk.f32.vlgmr.msra.gmra.mxu2 %vm250_vm0, %v240_v9  ;;  %578 = vmatmul.msk.f32.vlgmr.msra.gmra.mxu3 %vm250_vm0, %v240_v9 }
  0x30   : > { %573 = vmatmul.msk.f32.gmra.mxu0 %vm250_vm0, %v239_v10  ;;  %577 = vmatmul.msk.f32.gmra.mxu1 %vm250_vm0, %v239_v10 }
  0x32   : > { %575 = vmatmul.msk.f32.gmra.mxu2 %vm250_vm0, %v241_v11  ;;  %579 = vmatmul.msk.f32.gmra.mxu3 %vm250_vm0, %v241_v11 }
  0xa5   : > { %v280_v12 = vpop.f32.mrf.mxu0  ;;  %v309_v13 = vpop.f32.mrf.mxu1 }
  0xa6   : > { %353 = vxpose.xlu1.b32.start [1/4] (short) %v309_v13, 128  ;;  %321 = vxpose.xlu0.b32.start [1/4] (short) %v280_v12, 128 }
  0xad   : > { %v283_v14 = vpop.f32.mrf.mxu0  ;;  %v312_v15 = vpop.f32.mrf.mxu1 }
  0xae   : > { %354 = vxpose.xlu1.b32.cont [2/4] (short) %v312_v15, 128  ;;  %322 = vxpose.xlu0.b32.cont [2/4] (short) %v283_v14, 128  ;;  %v286_v16 = vpop.f32.mrf.mxu2  ;;  %v315_v17 = vpop.f32.mrf.mxu3 }
  0xb6   : > { %355 = vxpose.xlu1.b32.cont [3/4] (short) %v315_v17, 128  ;;  %323 = vxpose.xlu0.b32.cont [3/4] (short) %v286_v16, 128  ;;  %v289_v18 = vpop.f32.mrf.mxu2  ;;  %v318_v19 = vpop.f32.mrf.mxu3 }
  0xbe   : > { %356 = vxpose.xlu1.b32.end [4/4] (short) %v318_v19, 128  ;;  %324 = vxpose.xlu0.b32.end [4/4] (short) %v289_v18, 128 }
 0x14a   : > { %v369_v21 = vpop.trf.xlu1  ;;  %v337_v22 = vpop.trf.xlu0 }
 0x14b   : > { %v405_v23 = vadd.f32 %v908_v20, %v369_v21  ;;  %v389_v24 = vadd.f32 %v908_v20, %v337_v22 }
 0x14d   : > { %438 = vst.msk [vmem:[%s913_s7 + $0x80] sm:$0xff] %vm421_vm1, %v405_v23 }
 0x14e   : > { %422 = vst.msk [vmem:[%s913_s7] sm:$0xff] %vm421_vm1, %v389_v24 }
 0x152   : > { %v370_v25 = vpop.trf.xlu1  ;;  %v338_v26 = vpop.trf.xlu0 }
 0x153   : > { %v406_v27 = vadd.f32 %v908_v20, %v370_v25  ;;  %v390_v28 = vadd.f32 %v908_v20, %v338_v26 }
 0x155   : > { %439 = vst.msk [vmem:[%s913_s7 + $0x88] sm:$0xff] %vm421_vm1, %v406_v27 }
 0x156   : > { %423 = vst.msk [vmem:[%s913_s7 + $0x8] sm:$0xff] %vm421_vm1, %v390_v28 }
 0x15a   : > { %v371_v29 = vpop.trf.xlu1  ;;  %v339_v30 = vpop.trf.xlu0 }
 0x15b   : > { %v407_v31 = vadd.f32 %v908_v20, %v371_v29  ;;  %v391_v32 = vadd.f32 %v908_v20, %v339_v30 }
 0x15d   : > { %440 = vst.msk [vmem:[%s913_s7 + $0x90] sm:$0xff] %vm421_vm1, %v407_v31 }
 0x15e   : > { %424 = vst.msk [vmem:[%s913_s7 + $0x10] sm:$0xff] %vm421_vm1, %v391_v32 }
 0x162   : > { %v372_v33 = vpop.trf.xlu1  ;;  %v340_v34 = vpop.trf.xlu0 }
 0x163   : > { %v408_v35 = vadd.f32 %v908_v20, %v372_v33  ;;  %v392_v36 = vadd.f32 %v908_v20, %v340_v34 }
 0x165   : > { %441 = vst.msk [vmem:[%s913_s7 + $0x98] sm:$0xff] %vm421_vm1, %v408_v35 }
 0x166   : > { %425 = vst.msk [vmem:[%s913_s7 + $0x18] sm:$0xff] %vm421_vm1, %v392_v36 }
 0x16a   : > { %v373_v37 = vpop.trf.xlu1  ;;  %v341_v38 = vpop.trf.xlu0 }
 0x16b   : > { %v409_v39 = vadd.f32 %v908_v20, %v373_v37  ;;  %v393_v40 = vadd.f32 %v908_v20, %v341_v38 }
 0x16d   : > { %442 = vst.msk [vmem:[%s913_s7 + $0xa0] sm:$0xff] %vm421_vm1, %v409_v39 }
 0x16e   : > { %426 = vst.msk [vmem:[%s913_s7 + $0x20] sm:$0xff] %vm421_vm1, %v393_v40 }
 0x172   : > { %v374_v41 = vpop.trf.xlu1  ;;  %v342_v42 = vpop.trf.xlu0 }
 0x173   : > { %v410_v43 = vadd.f32 %v908_v20, %v374_v41  ;;  %v394_v44 = vadd.f32 %v908_v20, %v342_v42 }
 0x175   : > { %443 = vst.msk [vmem:[%s913_s7 + $0xa8] sm:$0xff] %vm421_vm1, %v410_v43 }
 0x176   : > { %427 = vst.msk [vmem:[%s913_s7 + $0x28] sm:$0xff] %vm421_vm1, %v394_v44 }
 0x17a   : > { %v375_v45 = vpop.trf.xlu1  ;;  %v343_v46 = vpop.trf.xlu0 }
 0x17b   : > { %v411_v47 = vadd.f32 %v908_v20, %v375_v45  ;;  %v395_v48 = vadd.f32 %v908_v20, %v343_v46 }
 0x17d   : > { %444 = vst.msk [vmem:[%s913_s7 + $0xb0] sm:$0xff] %vm421_vm1, %v411_v47 }
 0x17e   : > { %428 = vst.msk [vmem:[%s913_s7 + $0x30] sm:$0xff] %vm421_vm1, %v395_v48 }
 0x182   : > { %v376_v49 = vpop.trf.xlu1  ;;  %v344_v50 = vpop.trf.xlu0 }
 0x183   : > { %v412_v51 = vadd.f32 %v908_v20, %v376_v49  ;;  %v396_v52 = vadd.f32 %v908_v20, %v344_v50 }
 0x185   : > { %445 = vst.msk [vmem:[%s913_s7 + $0xb8] sm:$0xff] %vm421_vm1, %v412_v51 }
 0x186   : > { %429 = vst.msk [vmem:[%s913_s7 + $0x38] sm:$0xff] %vm421_vm1, %v396_v52 }
 0x18a   : > { %v377_v53 = vpop.trf.xlu1  ;;  %v345_v54 = vpop.trf.xlu0 }
 0x18b   : > { %v413_v55 = vadd.f32 %v908_v20, %v377_v53  ;;  %v397_v56 = vadd.f32 %v908_v20, %v345_v54 }
 0x18d   : > { %446 = vst.msk [vmem:[%s913_s7 + $0xc0] sm:$0xff] %vm421_vm1, %v413_v55 }
 0x18e   : > { %430 = vst.msk [vmem:[%s913_s7 + $0x40] sm:$0xff] %vm421_vm1, %v397_v56 }
 0x192   : > { %v378_v57 = vpop.trf.xlu1  ;;  %v346_v58 = vpop.trf.xlu0 }
 0x193   : > { %v414_v59 = vadd.f32 %v908_v20, %v378_v57  ;;  %v398_v60 = vadd.f32 %v908_v20, %v346_v58 }
 0x195   : > { %447 = vst.msk [vmem:[%s913_s7 + $0xc8] sm:$0xff] %vm421_vm1, %v414_v59 }
 0x196   : > { %431 = vst.msk [vmem:[%s913_s7 + $0x48] sm:$0xff] %vm421_vm1, %v398_v60 }
 0x19a   : > { %v379_v61 = vpop.trf.xlu1  ;;  %v347_v62 = vpop.trf.xlu0 }
 0x19b   : > { %v415_v63 = vadd.f32 %v908_v20, %v379_v61  ;;  %v399_v0 = vadd.f32 %v908_v20, %v347_v62 }
 0x19d   : > { %448 = vst.msk [vmem:[%s913_s7 + $0xd0] sm:$0xff] %vm421_vm1, %v415_v63 }
 0x19e   : > { %432 = vst.msk [vmem:[%s913_s7 + $0x50] sm:$0xff] %vm421_vm1, %v399_v0 }
 0x1a2   : > { %v380_v1 = vpop.trf.xlu1  ;;  %v348_v2 = vpop.trf.xlu0 }
 0x1a3   : > { %v416_v3 = vadd.f32 %v908_v20, %v380_v1  ;;  %v400_v4 = vadd.f32 %v908_v20, %v348_v2 }
 0x1a5   : > { %449 = vst.msk [vmem:[%s913_s7 + $0xd8] sm:$0xff] %vm421_vm1, %v416_v3 }
 0x1a6   : > { %433 = vst.msk [vmem:[%s913_s7 + $0x58] sm:$0xff] %vm421_vm1, %v400_v4 }
 0x1aa   : > { %v381_v5 = vpop.trf.xlu1  ;;  %v349_v6 = vpop.trf.xlu0 }
 0x1ab   : > { %v417_v7 = vadd.f32 %v908_v20, %v381_v5  ;;  %v401_v8 = vadd.f32 %v908_v20, %v349_v6 }
 0x1ad   : > { %450 = vst.msk [vmem:[%s913_s7 + $0xe0] sm:$0xff] %vm421_vm1, %v417_v7 }
 0x1ae   : > { %434 = vst.msk [vmem:[%s913_s7 + $0x60] sm:$0xff] %vm421_vm1, %v401_v8 }
 0x1b2   : > { %v382_v9 = vpop.trf.xlu1  ;;  %v350_v10 = vpop.trf.xlu0 }
 0x1b3   : > { %v418_v11 = vadd.f32 %v908_v20, %v382_v9  ;;  %v402_v12 = vadd.f32 %v908_v20, %v350_v10 }
 0x1b5   : > { %451 = vst.msk [vmem:[%s913_s7 + $0xe8] sm:$0xff] %vm421_vm1, %v418_v11 }
 0x1b6   : > { %435 = vst.msk [vmem:[%s913_s7 + $0x68] sm:$0xff] %vm421_vm1, %v402_v12 }
 0x1ba   : > { %v383_v13 = vpop.trf.xlu1  ;;  %v351_v14 = vpop.trf.xlu0 }
 0x1bb   : > { %v419_v15 = vadd.f32 %v908_v20, %v383_v13  ;;  %v403_v16 = vadd.f32 %v908_v20, %v351_v14 }
 0x1bd   : > { %452 = vst.msk [vmem:[%s913_s7 + $0xf0] sm:$0xff] %vm421_vm1, %v419_v15 }
 0x1be   : > { %436 = vst.msk [vmem:[%s913_s7 + $0x70] sm:$0xff] %vm421_vm1, %v403_v16 }
 0x1c2   : > { %v384_v17 = vpop.trf.xlu1  ;;  %v352_v18 = vpop.trf.xlu0 }
 0x1c3   : > { %v420_v19 = vadd.f32 %v908_v20, %v384_v17  ;;  %v404_v21 = vadd.f32 %v908_v20, %v352_v18 }
 0x1c5   : > { %453 = vst.msk [vmem:[%s913_s7 + $0xf8] sm:$0xff] %vm421_vm1, %v420_v19 }
 0x1c6   : > { %437 = vst.msk [vmem:[%s913_s7 + $0x78] sm:$0xff] %vm421_vm1, %v404_v21 }
 0x1c7 PF: > { %s17_s17 = sadd.s32 1, %s778_s17   ;;  %s1037_s12 = smov %s762_s13 }
 0x1c8   : > { %p14_p2 = scmp.ge.s32.totalorder %s17_s17, 4   ;;  %s1038_s13 = smov %s766_s14 }
 0x1c9   : > { %s1039_s14 = smov %s875_s9  ;;  %s1040_s15 = smov %s774_s16 }
 0x1ca   : > { %s1041_s16 = smov %s1043_s29  ;;  %16 = sbr.rel (!%p14_p2) target bundleno = 5 (0x5), region = 76 }
 0x1cf   :  { %484 = vsyncpa [#allocation3], 1 }
 0x1d0   :  { %486 = vsyncpa [#allocation3 + $0x1], 1 }
 0x1d1   :  { %487 = vsyncpa [#allocation5], 1 }

</bundles_post_ra>
